<compile_context>
chip_gen: v7x
topology: tpu7x:2x2x1
jax: 0.10.0
libtpu: 0.0.40
codegen_flags: <defaults>
</compile_context>

<pallas_src>
import numpy as np
import jax
import jax.numpy as jnp
from jax.experimental import pallas as pl
from jax.experimental.pallas import tpu as pltpu


# --------------------------- patch extraction (JAX) ---------------------------
def _patch_windows(x, kernel, stride, dilation):
    """Shared window gather; returns (b, i, kh, j, kw, c) windows + out dims."""
    b, h, w, c = x.shape
    h2 = int(np.ceil(h / stride))
    w2 = int(np.ceil(w / stride))
    pad_row = (h2 - 1) * stride + (kernel - 1) * dilation + 1 - h
    pad_col = (w2 - 1) * stride + (kernel - 1) * dilation + 1 - w
    # torch F.pad pair ordering on NHWC is (c, w, h) from the last dim backwards,
    # with constant pad value 1 (reproduced exactly; h gets the pad_col pair).
    xp = jnp.pad(
        x,
        ((0, 0),
         (pad_col // 2, pad_col - pad_col // 2),   # h axis gets the "pad_col" pair
         (pad_row // 2, pad_row - pad_row // 2),   # w axis gets the "pad_row" pair
         (0, 0)),
        mode="constant", constant_values=1.0)
    Hp, Wp = xp.shape[1], xp.shape[2]
    H_out = (Hp - kernel) // stride + 1
    W_out = (Wp - kernel) // stride + 1
    # NOTE: torch's .unfold has no dilation argument, so (faithfully) the index
    # arithmetic ignores dilation; only correct for dilation == 1.
    hh = jnp.arange(H_out)[:, None] * stride + jnp.arange(kernel)[None, :]  # (H_out, K)
    ww = jnp.arange(W_out)[:, None] * stride + jnp.arange(kernel)[None, :]  # (W_out, K)
    p = xp[:, hh]              # (b, H_out, Kh, Wp, c)
    p = p[:, :, :, ww]         # (b, H_out, Kh, W_out, Kw, c)
    return p, H_out, W_out


def extract_image_patches(x, kernel, stride=1, dilation=1):
    """Faithful port of the torch extract_image_patches (NHWC input)."""
    b, h, w, c = x.shape
    p, _, _ = _patch_windows(x, kernel, stride, dilation)
    # torch: (b, i, j, c, kh, kw).permute(0,1,2,5,3,4) -> (b, i, j, kw, c, kh)
    p = jnp.transpose(p, (0, 1, 3, 4, 5, 2))       # (b, i, j, kw, c, kh)
    return p.reshape(b, h // stride, w // stride, -1)


def extract_image_patches_t(x, kernel, stride=1, dilation=1):
    """Same patches, emitted directly as the transposed (F, N) slab the kernel
    consumes (feature axes first, N = b*i*j last/lane axis) -- avoids a separate
    XLA transpose of the patch tensor (an extra HBM read+write)."""
    b, h, w, c = x.shape
    p, H_out, W_out = _patch_windows(x, kernel, stride, dilation)
    assert H_out == h // stride and W_out == w // stride
    p = jnp.transpose(p, (4, 5, 2, 0, 1, 3))       # (kw, c, kh, b, i, j)
    F = kernel * c * kernel
    N = b * H_out * W_out
    return p.reshape(F, N), (b, H_out, W_out, F)


# ------------------------------ Pallas kernel -------------------------------
def sgxf_kernel(xt_ref, w_ref, c1_ref, rm2_ref, o_ref):
    # xt_ref : (F, TN)  patch columns, N on the 128-lane axis
    # w_ref  : (OC, F)  fused weight  W_eff = weight - weight_rand_mask
    # c1_ref : (OC, 1)  precomputed pre-bias  W_eff @ rm^T
    # rm2_ref: (OC, 1)  additive output mask column
    # o_ref  : (OC, TN) transposed output (lane-dense, unmasked full-width vst)
    acc = jnp.dot(w_ref[...], xt_ref[...], preferred_element_type=jnp.float32)  # single MXU dot
    o_ref[...] = jnp.tanh(acc - c1_ref[...]) + rm2_ref[...]                      # EUP tanh + tiny VPU epilogue


# ------------------------------- wrapper ------------------------------------
def _vmem_budget_bytes():
    """Generation-aware scoped-VMEM budget (v5e/v6e: 128 MiB phys, v7x: 64 MiB)."""
    try:
        phys = int(pltpu.get_tpu_info().vmem_capacity_bytes)
    except Exception:
        phys = 64 * 1024 * 1024          # conservative fallback: v7x physical VMEM
    return int(min(max(phys // 2, 16 * 1024 * 1024), 64 * 1024 * 1024))


def _num_tensorcores():
    try:
        kind = jax.devices()[0].device_kind.lower()
    except Exception:
        return 1
    return 2 if "v7" in kind else 1      # v7x: 2 TCs/chip; v5e/v6e: 1


def _pick_tile_n(n, f, oc, vmem_budget, num_tc):
    """Largest lane-dense TN that keeps double-buffered tiles within VMEM."""
    per_col = 2 * (f + oc) * 4                      # input+output column, double-buffered, f32
    cap = (vmem_budget // 2) // per_col             # leave half the budget as headroom
    cap = int(max(128, min(cap, 8192)))
    tn = min(pl.cdiv(n, 128) * 128, cap)
    tn = (tn // 256) * 256 if tn >= 256 else 128    # keep 256-wide-MXU friendly when possible
    if num_tc >= 2:
        # keep >= num_tc tiles so both v7x TensorCores get work (megacore split)
        while n > 128 and pl.cdiv(n, tn) < num_tc and tn > 128:
            tn = max(128, tn // 2)
    return tn


def conv_alt_forward(x, weight, mask, kernel, stride):
    """ConvAlt.forward: patches -> MyFunction2.forward (== SGXF)."""
    x = x.astype(jnp.float32)
    xt, (B, H2, W2, F) = extract_image_patches_t(x, kernel, stride)   # (F, N) slab
    OC = weight.shape[0]

    # Literal broadcasting requirements of the reference implementation.
    assert B == 1 and H2 == F and OC == H2, "reference code only well-formed here"

    # MyFunction2.forward's `if input.shape[1] == 784:` branch computes an unused
    # tensor -> no effect on the output, intentionally omitted.
    rand_mask = mask[0:B, 0:H2].astype(jnp.float32)              # (1, F)
    weight_rand_mask = mask[0:OC, 0:F].astype(jnp.float32)       # (OC, F)
    # rm2 is mask[0:c.shape[0], 0:c.shape[1]]; under the asserted shapes it is
    # the (1, OC) per-output-channel additive mask (fragile if asserts relaxed).
    rm2 = mask[0:B, 0:H2].astype(jnp.float32)                    # (1, OC)

    # Exact algebraic fusion: tanh(X@W^T - rm@W^T - X@WRM^T + rm@WRM^T)
    #                       = tanh(X @ W_eff^T - rm @ W_eff^T),  W_eff = W - WRM.
    w_eff = weight.astype(jnp.float32) - weight_rand_mask        # (OC, F), once
    c1_t = w_eff @ rand_mask.T                                   # (OC, 1) pre-bias, once
    rm2_t = rm2.T                                                # (OC, 1)

    N = B * H2 * W2
    vmem_budget = _vmem_budget_bytes()
    num_tc = _num_tensorcores()
    TN = _pick_tile_n(N, F, OC, vmem_budget, num_tc)
    N_pad = pl.cdiv(N, TN) * TN
    if N_pad != N:
        # Pad N to a lane-dense multiple of TN (padded columns sliced off below);
        # far cheaper than masked partial stores over the whole output.
        xt = jnp.pad(xt, ((0, 0), (0, N_pad - N)))
    grid_n = N_pad // TN

    cost = pl.CostEstimate(
        flops=2 * N_pad * F * OC,
        transcendentals=N_pad * OC,
        bytes_accessed=4 * (F * N_pad + OC * F + OC * N_pad + 2 * OC),
    )

    out_t = pl.pallas_call(
        sgxf_kernel,
        out_shape=jax.ShapeDtypeStruct((OC, N_pad), jnp.float32),
        grid_spec=pltpu.PrefetchScalarGridSpec(
            num_scalar_prefetch=0,
            grid=(grid_n,),
            in_specs=[
                pl.BlockSpec((F, TN), lambda i: (0, i)),   # X^T tile (streams)
                pl.BlockSpec((OC, F), lambda i: (0, 0)),   # W_eff   (grid-invariant)
                pl.BlockSpec((OC, 1), lambda i: (0, 0)),   # pre-bias(grid-invariant)
                pl.BlockSpec((OC, 1), lambda i: (0, 0)),   # rm2     (grid-invariant)
            ],
            out_specs=pl.BlockSpec((OC, TN), lambda i: (0, i)),
        ),
        compiler_params=pltpu.CompilerParams(
            dimension_semantics=("parallel",),
            vmem_limit_bytes=vmem_budget,
        ),
        cost_estimate=cost,
    )(xt, w_eff, c1_t, rm2_t)

    # Un-transpose / un-pad in the wrapper (layout plumbing, not compute).
    out_t = out_t[:, :N]
    return out_t.T.reshape(B, H2, W2, OC)


# ----------------------------------- main ------------------------------------
if __name__ == "__main__":
    key = jax.random.PRNGKey(0)
    k_mask, k_w, k_b, k_x = jax.random.split(key, 4)

    # Shapes chosen so the original module's broadcasting is well-formed:
    # B=1, H=W=16, IC=1, K=4, stride=1  =>  H2 = 16 = IC*K*K = F = OC.
    B, H, W, IC = 1, 16, 16, 1
    K, S = 4, 1
    F = IC * K * K
    OC = 16

    # TODO(synk): super_mega_mask is pickle-loaded from 'mask.p' in the original;
    # replaced with a deterministic synthetic mask of sufficient extent.
    mask = jax.random.uniform(k_mask, (32, 64), jnp.float32, minval=-1.0, maxval=1.0)

    # ConvAlt.__init__: weight ~ U(-0.1,0.1) + mask slice; bias ~ U(-0.1,0.1).
    weight = jax.random.uniform(k_w, (OC, F), jnp.float32, minval=-0.1, maxval=0.1) \
             + mask[0:OC, 0:F]
    bias = jax.random.uniform(k_b, (OC,), jnp.float32, minval=-0.1, maxval=0.1)
    # bias is a parameter of ConvAlt but SGXF never uses it in the forward pass.

    x = jax.random.uniform(k_x, (B, H, W, IC), jnp.float32)

    out = conv_alt_forward(x, weight, mask, K, S)
    out = jax.block_until_ready(out)

    # Pure-JAX reference of the original (unfused) 4-dot formula, for numerics.
    patches = extract_image_patches(x, K, S)
    rm = mask[0:B, 0:patches.shape[1]]
    wrm = mask[0:OC, 0:F]
    c = jnp.einsum('bijf,of->bijo', patches, weight)
    diff = rm @ weight.T
    diff2 = jnp.einsum('bijf,of->bijo', patches, wrm)
    diff3 = rm @ wrm.T
    ref = jnp.tanh(c - diff - diff2 + diff3) + mask[0:B, 0:patches.shape[1]]

    assert out.shape == (B, H // S, W // S, OC)
    # Fused formula reassociates the FP sum vs. the 4-dot reference; tolerance
    # documented accordingly (outputs are O(1), so atol=2e-5 is still tight).
    np.testing.assert_allclose(np.asarray(out), np.asarray(ref), rtol=1e-4, atol=2e-5)
    print("KERNEL_OK")
</pallas_src>

<mosaic_0001>
module attributes {stable_mosaic.version = 11 : i64} {
  func.func @sgxf_kernel(%arg0: i32, %arg1: memref<16x256xf32, #tpu.memory_space<vmem>>, %arg2: memref<16x16xf32, #tpu.memory_space<vmem>>, %arg3: memref<16x1xf32, #tpu.memory_space<vmem>>, %arg4: memref<16x1xf32, #tpu.memory_space<vmem>>, %arg5: memref<16x256xf32, #tpu.memory_space<vmem>>) attributes {dimension_semantics = [#tpu.dimension_semantics<parallel>], iteration_bounds = array<i64: 1>, scalar_prefetch = 0 : i64, scratch_operands = 0 : i64, tpu.core_type = #tpu.core_type<tc>, window_params = [{transform_indices = @transform_0, window_bounds = array<i64: 16, 256>}, {pipeline_mode = #tpu.pipeline_mode<synchronous>, transform_indices = @transform_1, window_bounds = array<i64: 16, 16>}, {pipeline_mode = #tpu.pipeline_mode<synchronous>, transform_indices = @transform_2, window_bounds = array<i64: 16, 1>}, {pipeline_mode = #tpu.pipeline_mode<synchronous>, transform_indices = @transform_3, window_bounds = array<i64: 16, 1>}, {transform_indices = @transform_4, window_bounds = array<i64: 16, 256>}]} {
    %c0 = arith.constant 0 : index
    %c0_0 = arith.constant 0 : index
    %0 = vector.load %arg2[%c0, %c0_0] : memref<16x16xf32, #tpu.memory_space<vmem>>, vector<16x16xf32>
    %c0_1 = arith.constant 0 : index
    %c0_2 = arith.constant 0 : index
    %1 = vector.load %arg1[%c0_1, %c0_2] : memref<16x256xf32, #tpu.memory_space<vmem>>, vector<16x256xf32>
    %cst = arith.constant dense<0.000000e+00> : vector<16x256xf32>
    %2 = tpu.matmul %0, %1, %cst {dimension_numbers = #tpu.dot_dimension_numbers<[1], [0], [0], [1], [0, 0, 1, 1], [], []>} : vector<16x16xf32>, vector<16x256xf32>, vector<16x256xf32> -> vector<16x256xf32>
    %c0_3 = arith.constant 0 : index
    %c0_4 = arith.constant 0 : index
    %3 = vector.load %arg3[%c0_3, %c0_4] : memref<16x1xf32, #tpu.memory_space<vmem>>, vector<16x1xf32>
    %4 = vector.broadcast %3 : vector<16x1xf32> to vector<16x256xf32>
    %5 = arith.subf %2, %4 : vector<16x256xf32>
    %6 = math.tanh %5 : vector<16x256xf32>
    %c0_5 = arith.constant 0 : index
    %c0_6 = arith.constant 0 : index
    %7 = vector.load %arg4[%c0_5, %c0_6] : memref<16x1xf32, #tpu.memory_space<vmem>>, vector<16x1xf32>
    %8 = vector.broadcast %7 : vector<16x1xf32> to vector<16x256xf32>
    %9 = arith.addf %6, %8 : vector<16x256xf32>
    %c0_7 = arith.constant 0 : index
    %c0_8 = arith.constant 0 : index
    %10 = vector.load %arg5[%c0_7, %c0_8] : memref<16x256xf32, #tpu.memory_space<vmem>>, vector<16x256xf32>
    tpu.vector_store %arg5[%c0_7, %c0_8], %9 {strides = array<i32>} : memref<16x256xf32, #tpu.memory_space<vmem>>, vector<16x256xf32>,
    return
  }
  func.func @transform_0(%arg0: i32) -> (i32, i32) {
    %c0_i32 = arith.constant 0 : i32
    %c0_i32_0 = arith.constant 0 : i32
    return %c0_i32, %arg0 : i32, i32
  }
  func.func @transform_1(%arg0: i32) -> (i32, i32) {
    %c0_i32 = arith.constant 0 : i32
    %c0_i32_0 = arith.constant 0 : i32
    %c0_i32_1 = arith.constant 0 : i32
    return %c0_i32, %c0_i32_0 : i32, i32
  }
  func.func @transform_2(%arg0: i32) -> (i32, i32) {
    %c0_i32 = arith.constant 0 : i32
    %c0_i32_0 = arith.constant 0 : i32
    %c0_i32_1 = arith.constant 0 : i32
    return %c0_i32, %c0_i32_0 : i32, i32
  }
  func.func @transform_3(%arg0: i32) -> (i32, i32) {
    %c0_i32 = arith.constant 0 : i32
    %c0_i32_0 = arith.constant 0 : i32
    %c0_i32_1 = arith.constant 0 : i32
    return %c0_i32, %c0_i32_0 : i32, i32
  }
  func.func @transform_4(%arg0: i32) -> (i32, i32) {
    %c0_i32 = arith.constant 0 : i32
    %c0_i32_0 = arith.constant 0 : i32
    return %c0_i32, %arg0 : i32, i32
  }
}

</mosaic_0001>

<bundles_post_ra>
// kernel: tpu_custom_call.1
= control target key start
LH: loop header
LB: loop body
LE: loop exit
PB: predicated region body
PF: predicated region fallthrough
CT: control target
= control target key end

     0   :  { %9 = vsyncpa [#allocation3], 0  ;;  %s334_s0 = inlined_call_operand.vmem [shape: f32[16,256], index: 0, kind: input, shape index: {}]   ;;  %s335_s1 = inlined_call_operand.hbm [shape: f32[16,16], index: 1, kind: input, shape index: {}]   ;;  %s336_s2 = inlined_call_operand.vmem [shape: f32[16,1], index: 2, kind: input, shape index: {}]   ;;  %s337_s3 = inlined_call_operand.vmem [shape: f32[16,1], index: 3, kind: input, shape index: {}]   ;;  %s338_s4 = inlined_call_operand.hbm [shape: f32[16,256], index: 4, kind: output, shape index: {}]  }
   0x1   :  { %10 = vsyncpa [#allocation4], 0  ;;  %s253_s15 = smov [#allocation2]   ;;  %s205_s19 = scalar_lea.hbm %s335_s1, 256 }
   0x2   :  { %s18_s16 = sshll.u32 %s253_s15, 4  ;;  %p206_p0 = scmp.ne.s32.totalorder %s335_s1, %s205_s19  ;;  %s19_s16 = int_to_ptr.vmem [resolvable:$true] %s18_s16 }
   0x3   :  { %p209_p1 = scmp.lt.u32.totalorder %s205_s19, %s335_s1 }
   0x5   :  { %p211_p2 = pnand %p209_p1, %p206_p0 }
   0x7   :  { %214 = shalt.err (!%p211_p2)
}
   0x8   :  { %s215_s24 = scalar_lea.vmem %s19_s16, 256  ;;  %p220_p4 = scmp.lt.s32.totalorder %s19_s16, %s19_s16 }
   0x9   :  { %p216_p3 = scmp.ne.s32.totalorder %s19_s16, %s215_s24  ;;  %p221_p5 = scmp.lt.s32.totalorder %s215_s24, %s215_s24 }
   0xb   :  { %p222_p6 = por %p221_p5, %p220_p4 }
   0xd   :  { %p223_p7 = pnand %p222_p6, %p216_p3 }
   0xf   :  { %226 = shalt.err (!%p223_p7)
}
  0x10   :  { %s254_s25 = smov 128   ;;  %s255_s26 = smov 8  }
  0x11   :  { %24 = dma.hbm_to_vmem [thread:$0]  %s335_s1, 256, %s19_s16, [#allocation3], %s254_s25, %s254_s25, %s255_s26  }
  0x12   :  { %249 = dma.done.wait [#allocation3], 256  }
  0x13   :  { %250 = vsyncadd [#allocation3], 4294967040  ;;  %v256_v0 = vmov 0.0   ;;  %v257_v1 = vmov 0   ;;  %v35_v2 = vld [vmem:[%s334_s0 + $0x8] sm:$0xff]  ;;  %v37_v3 = vld [vmem:[%s334_s0 + $0x18] sm:$0xff] }
  0x14   :  { %109 = vmatprep.mubr.f32.mxu0 %v256_v0  ;;  %115 = vmatprep.mubr.f32.mxu1 %v256_v0  ;;  %v34_v4 = vld [vmem:[%s334_s0] sm:$0xff]  ;;  %v181_v5 = vpack.c.bf16 %v37_v3, %v35_v2  ;;  %v36_v6 = vld [vmem:[%s334_s0 + $0x10] sm:$0xff]  ;;  %vm38_vm0 = vcmask 130048   ;;  %v33_v11 = vld [vmem:[#allocation2 + $0x8] sm:$0xff] }
  0x15   :  { %195 = vset.pattern.permute.xlu0 %v257_v1  ;;  %196 = vset.pattern.permute.xlu1 %v257_v1  ;;  %v183_v7 = vpack.c.bf16 %v36_v6, %v34_v4  ;;  %v122_v8 = vld [vmem:[%s336_s2] sm:$0xff]  ;;  %v123_v12 = vld [vmem:[%s336_s2 + $0x8] sm:$0xff]  ;;  %s258_s2 = smov [#allocation5]  }
  0x16   :  { %v142_v9 = vld [vmem:[%s337_s3] sm:$0xff]  ;;  %182 = vmatprep.subr.bf16.mxu0 %v181_v5  ;;  %185 = vmatprep.subr.bf16.mxu1 %v181_v5  ;;  %v143_v13 = vld [vmem:[%s337_s3 + $0x8] sm:$0xff]  ;;  %s167_s3 = sshll.u32 %s258_s2, 4  ;;  %s168_s3 = int_to_ptr.vmem [resolvable:$true] %s167_s3 }
  0x17   :  { %184 = vmatpush1.bf16.msra.mxu0 %v183_v7  ;;  %186 = vmatpush1.bf16.msra.mxu1 %v183_v7  ;;  %v32_v10 = vld [vmem:[#allocation2] sm:$0xff]  ;;  %s227_s17 = scalar_lea.vmem %s168_s3, 512  ;;  %p232_p9 = scmp.lt.s32.totalorder %s168_s3, %s168_s3 }
  0x18   :  { %126 = vperm.xlu0 %195, %v122_v8   ;;  %146 = vperm.xlu1 %196, %v142_v9   ;;  %p228_p8 = scmp.ne.s32.totalorder %s168_s3, %s227_s17  ;;  %p233_p10 = scmp.lt.s32.totalorder %s227_s17, %s227_s17 }
  0x1a   :  { %179 = vmatmul.mubr.msk.f32.vlgmr.msra.gmra.mrb[0].mxu0 %vm38_vm0, %v32_v10  ;;  %180 = vmatmul.mubr.msk.f32.vlgmr.msra.gmra.mrb[0].mxu1 %vm38_vm0, %v33_v11  ;;  %p234_p11 = por %p233_p10, %p232_p9 }
  0x1c   :  { %131 = vperm.xlu0 %195, %v123_v12   ;;  %151 = vperm.xlu1 %196, %v143_v13   ;;  %p235_p12 = pnand %p234_p11, %p228_p8 }
  0x97   :  { %v127_v14 = vpop.permute.xlu0 %126  ;;  %v147_v24 = vpop.permute.xlu1 %146 }
  0x9b   :  { %v132_v15 = vpop.permute.xlu0 %131  ;;  %v152_v28 = vpop.permute.xlu1 %151 }
  0xed   :  { %v111_v16 = vpop.f32.mrb[0].mxu0  ;;  %v117_v17 = vpop.f32.mrb[0].mxu1 }
  0xee   :  { %v134_v18 = vsub.f32 %v111_v16, %v127_v14  ;;  %v136_v19 = vsub.f32 %v117_v17, %v132_v15  ;;  %v113_v20 = vpop.f32.mrb[1].mxu0  ;;  %v119_v21 = vpop.f32.mrb[1].mxu1 }
  0xef   :  { %v135_v22 = vsub.f32 %v113_v20, %v127_v14  ;;  %v137_v23 = vsub.f32 %v119_v21, %v132_v15 }
  0xf0   :  { %197 = vtanh.f32 %v134_v18 }
  0xf1   :  { %199 = vtanh.f32 %v136_v19 }
  0xf2   :  { %201 = vtanh.f32 %v135_v22 }
  0xf3   :  { %203 = vtanh.f32 %v137_v23 }
  0xfa   :  { %v198_v25 = vpop.eup %197 }
  0xfb   :  { %v200_v26 = vpop.eup %199  ;;  %v154_v27 = vadd.f32 %v198_v25, %v147_v24 }
  0xfc   :  { %v202_v29 = vpop.eup %201  ;;  %v156_v30 = vadd.f32 %v200_v26, %v152_v28 }
  0xfd   :  { %v204_v31 = vpop.eup %203  ;;  %v155_v32 = vadd.f32 %v202_v29, %v147_v24  ;;  %158 = vst [vmem:[#allocation5] sm:$0xff] %v154_v27 }
  0xfe   :  { %v157_v33 = vadd.f32 %v204_v31, %v152_v28  ;;  %160 = vst [vmem:[#allocation5 + $0x10] sm:$0xff] %v156_v30 }
  0xff   :  { %159 = vst [vmem:[#allocation5 + $0x8] sm:$0xff] %v155_v32 }
 0x100   :  { %161 = vst [vmem:[#allocation5 + $0x18] sm:$0xff] %v157_v33 }
 0x101   :  { %238 = shalt.err (!%p235_p12)
}
 0x102   :  { %s239_s20 = scalar_lea.hbm %s338_s4, 512 }
 0x103   :  { %p240_p13 = scmp.ne.s32.totalorder %s338_s4, %s239_s20  ;;  %p243_p0 = scmp.lt.u32.totalorder %s239_s20, %s338_s4 }
 0x105   :  { %p245_p1 = pnand %p243_p0, %p240_p13 }
 0x107   :  { %248 = shalt.err (!%p245_p1)
}
 0x108   :  { %s259_s25 = smov 256   ;;  %s260_s26 = smov 16  }
 0x109   :  { %173 = dma.vmem_to_hbm [thread:$0]  %s168_s3, 512, %s338_s4, [#allocation4], %s259_s25, %s259_s25, %s260_s26  }
 0x10a   :  { %251 = dma.done.wait [#allocation4], 512  }
 0x10b   :  { %252 = vsyncadd [#allocation4], 4294966784 }
 0x10c   :  { %177 = vsyncpa [#allocation3], 1 }
 0x10d   :  { %178 = vsyncpa [#allocation4], 1 }

</bundles_post_ra>
